<compile_context>
chip_gen: v5e
topology: v5e:2x2
jax: 0.10.0
libtpu: 0.0.40
codegen_flags: <defaults>
</compile_context>

<pallas_src>
import jax
import jax.numpy as jnp
from jax.experimental import pallas as pl
from jax.experimental.pallas import tpu as pltpu


def _round_up(x, m):
    return ((x + m - 1) // m) * m


def _choose_tile(B):
    """Batch tile size: single block for small B; otherwise >=2 grid steps,
    capped at 1024 rows, rounded to 8, minimising padded rows."""
    if B <= 256:
        return max(8, _round_up(B, 8))
    cap = 1024
    n_tiles = max(2, -(-B // cap))          # ceil(B / cap), but at least 2
    return _round_up(-(-B // n_tiles), 8)   # ceil(B / n_tiles) rounded to 8


def critic_kernel(state_ref, action_ref, w1_ref, b1_ref, w2s_ref, w2a_ref,
                  b2_ref, w3_ref, b3_ref, out_ref):
    w1 = w1_ref[...]
    dt = w1.dtype                        # matmul dtype (bf16 or f32)
    s = state_ref[...].astype(dt)        # [TB, S]
    a = action_ref[...].astype(dt)       # [TB, A]

    # fcs1: xs = relu(state @ W1 + b1)   (f32 accumulate, f32 elementwise)
    xs = jnp.dot(s, w1, preferred_element_type=jnp.float32) + b1_ref[...]
    xs = jnp.maximum(xs, 0.0)

    # fc2 on cat(xs, action): relu(xs @ W2s + action @ W2a + b2)
    h = (jnp.dot(xs.astype(dt), w2s_ref[...], preferred_element_type=jnp.float32)
         + jnp.dot(a, w2a_ref[...], preferred_element_type=jnp.float32)
         + b2_ref[...])
    h = jnp.maximum(h, 0.0)

    # fc3: q = sum_j h[:, j] * w3[j] + b3   (VPU multiply + lane reduce; avoids
    # an N=1 MXU matmul).  b3 is a scalar read from SMEM.
    q = jnp.sum(h * w3_ref[...], axis=-1, keepdims=True) + b3_ref[0]
    out_ref[...] = q


def critic_forward(state, action, kp):
    """state: [B, S] f32, action: [B, A] f32, kp: packed params (pack_params)."""
    B, S = state.shape
    A = action.shape[1]
    H1 = kp["w1"].shape[1]
    H2 = kp["w2s"].shape[1]

    TB = _choose_tile(B)
    B_pad = _round_up(B, TB)
    if B_pad != B:
        state = jnp.pad(state, ((0, B_pad - B), (0, 0)))
        action = jnp.pad(action, ((0, B_pad - B), (0, 0)))

    const = lambda i: (0, 0)
    out = pl.pallas_call(
        critic_kernel,
        out_shape=jax.ShapeDtypeStruct((B_pad, 1), jnp.float32),
        grid=(B_pad // TB,),
        in_specs=[
            pl.BlockSpec((TB, S), lambda i: (i, 0)),    # state (tiled over B)
            pl.BlockSpec((TB, A), lambda i: (i, 0)),    # action (tiled over B)
            pl.BlockSpec((S, H1), const),               # w1
            pl.BlockSpec((1, H1), const),               # b1
            pl.BlockSpec((H1, H2), const),              # w2 (xs part)
            pl.BlockSpec((A, H2), const),               # w2 (action part)
            pl.BlockSpec((1, H2), const),               # b2
            pl.BlockSpec((1, H2), const),               # w3 as a row
            pl.BlockSpec(memory_space=pltpu.MemorySpace.SMEM),  # b3 (1,) scalar
        ],
        out_specs=pl.BlockSpec((TB, 1), lambda i: (i, 0)),
        compiler_params=pltpu.CompilerParams(
            dimension_semantics=("parallel",)),
    )(state, action, kp["w1"], kp["b1"], kp["w2s"], kp["w2a"], kp["b2"],
      kp["w3row"], kp["b3"])
    return out[:B]


def init_params(key, state_size, action_size, fc1c_units=128, fc2c_units=128):
    """Deterministic init mirroring Critic.reset_parameters().

    NOTE: hidden_init() uses weight.size()[0] (= out_features), so
    lim = 1/sqrt(out_features); we replicate that behaviour.
    Weights are stored pre-transposed ([in, out]) so forward is x @ W + b.
    """
    ks = jax.random.split(key, 6)
    lim1 = 1.0 / (fc1c_units ** 0.5)
    lim2 = 1.0 / (fc2c_units ** 0.5)

    w1 = jax.random.uniform(ks[0], (state_size, fc1c_units), jnp.float32, -lim1, lim1)
    b1 = jax.random.uniform(ks[1], (1, fc1c_units), jnp.float32, -lim1, lim1)
    w2 = jax.random.uniform(ks[2], (fc1c_units + action_size, fc2c_units),
                            jnp.float32, -lim2, lim2)
    b2 = jax.random.uniform(ks[3], (1, fc2c_units), jnp.float32, -lim2, lim2)
    w3 = jax.random.uniform(ks[4], (fc2c_units, 1), jnp.float32, -0.003, 0.003)
    b3 = jax.random.uniform(ks[5], (1, 1), jnp.float32, -0.003, 0.003)
    return {"w1": w1, "b1": b1, "w2": w2, "b2": b2, "w3": w3, "b3": b3}


def pack_params(p, dot_dtype=jnp.bfloat16):
    """Re-layout parameters for the kernel.

    Matmul weights are cast to `dot_dtype` (bf16 by default: native MXU rate,
    half the VMEM/HBM bytes).  Biases / w3 stay f32 (elementwise path).
    Pass dot_dtype=jnp.float32 for exact parity with the PyTorch module.
    """
    H1 = p["w1"].shape[1]
    return {
        "w1": p["w1"].astype(dot_dtype),            # [S,  H1]
        "b1": p["b1"],                               # [1,  H1] f32
        "w2s": p["w2"][:H1, :].astype(dot_dtype),    # [H1, H2]
        "w2a": p["w2"][H1:, :].astype(dot_dtype),    # [A,  H2]
        "b2": p["b2"],                               # [1,  H2] f32
        "w3row": p["w3"].T,                          # [1,  H2] f32
        "b3": p["b3"].reshape(-1),                   # (1,)     f32 (SMEM scalar)
    }


def critic_reference(state, action, p):
    xs = jnp.maximum(state @ p["w1"] + p["b1"], 0.0)
    x = jnp.concatenate([xs, action], axis=1)
    h = jnp.maximum(x @ p["w2"] + p["b2"], 0.0)
    return h @ p["w3"] + p["b3"]


if __name__ == "__main__":
    key = jax.random.PRNGKey(0)
    k_state, k_action, k_params, k_big = jax.random.split(key, 4)

    state_size, action_size = 16, 4
    params = init_params(k_params, state_size, action_size)
    kp_f32 = pack_params(params, dot_dtype=jnp.float32)    # exact-parity path
    kp_bf16 = pack_params(params, dot_dtype=jnp.bfloat16)  # fast MXU path

    # --- small batch (per-step critic evaluation), single grid step ---
    batch = 8
    state = jax.random.normal(k_state, (batch, state_size), jnp.float32)
    action = jax.random.normal(k_action, (batch, action_size), jnp.float32)
    q_ref = critic_reference(state, action, params)

    q32 = jax.block_until_ready(critic_forward(state, action, kp_f32))
    assert q32.shape == (batch, 1)
    assert jnp.allclose(q32, q_ref, atol=1e-5, rtol=1e-5)

    q16 = jax.block_until_ready(critic_forward(state, action, kp_bf16))
    assert q16.shape == (batch, 1)
    assert jnp.allclose(q16, q_ref, atol=1.5e-3, rtol=2e-2)  # bf16 dot inputs

    # --- larger, non-multiple-of-tile batch: exercises adaptive TB (528),
    #     a 2-step "parallel" grid (megacore on v7x) and row padding ---
    big = 1050
    ks, ka = jax.random.split(k_big)
    state_b = jax.random.normal(ks, (big, state_size), jnp.float32)
    action_b = jax.random.normal(ka, (big, action_size), jnp.float32)
    qb_ref = critic_reference(state_b, action_b, params)

    qb32 = jax.block_until_ready(critic_forward(state_b, action_b, kp_f32))
    assert qb32.shape == (big, 1)
    assert jnp.allclose(qb32, qb_ref, atol=1e-4, rtol=1e-4)

    qb16 = jax.block_until_ready(critic_forward(state_b, action_b, kp_bf16))
    assert qb16.shape == (big, 1)
    assert jnp.allclose(qb16, qb_ref, atol=1.5e-3, rtol=2e-2)

    print("KERNEL_OK")
</pallas_src>

<mosaic_0001>
module attributes {stable_mosaic.version = 11 : i64} {
  func.func @critic_kernel(%arg0: i32, %arg1: memref<8x16xf32, #tpu.memory_space<vmem>>, %arg2: memref<8x4xf32, #tpu.memory_space<vmem>>, %arg3: memref<16x128xf32, #tpu.memory_space<vmem>>, %arg4: memref<1x128xf32, #tpu.memory_space<vmem>>, %arg5: memref<128x128xf32, #tpu.memory_space<vmem>>, %arg6: memref<4x128xf32, #tpu.memory_space<vmem>>, %arg7: memref<1x128xf32, #tpu.memory_space<vmem>>, %arg8: memref<1x128xf32, #tpu.memory_space<vmem>>, %arg9: memref<1xf32, #tpu.memory_space<smem>>, %arg10: memref<8x1xf32, #tpu.memory_space<vmem>>) attributes {dimension_semantics = [#tpu.dimension_semantics<parallel>], iteration_bounds = array<i64: 1>, scalar_prefetch = 0 : i64, scratch_operands = 0 : i64, tpu.core_type = #tpu.core_type<tc>, window_params = [{transform_indices = @transform_0, window_bounds = array<i64: 8, 16>}, {transform_indices = @transform_1, window_bounds = array<i64: 8, 4>}, {pipeline_mode = #tpu.pipeline_mode<synchronous>, transform_indices = @transform_2, window_bounds = array<i64: 16, 128>}, {pipeline_mode = #tpu.pipeline_mode<synchronous>, transform_indices = @transform_3, window_bounds = array<i64: 1, 128>}, {pipeline_mode = #tpu.pipeline_mode<synchronous>, transform_indices = @transform_4, window_bounds = array<i64: 128, 128>}, {pipeline_mode = #tpu.pipeline_mode<synchronous>, transform_indices = @transform_5, window_bounds = array<i64: 4, 128>}, {pipeline_mode = #tpu.pipeline_mode<synchronous>, transform_indices = @transform_6, window_bounds = array<i64: 1, 128>}, {pipeline_mode = #tpu.pipeline_mode<synchronous>, transform_indices = @transform_7, window_bounds = array<i64: 1, 128>}, {transform_indices = @transform_8, window_bounds = array<i64: 1>}, {transform_indices = @transform_9, window_bounds = array<i64: 8, 1>}]} {
    %c0 = arith.constant 0 : index
    %c0_0 = arith.constant 0 : index
    %0 = vector.load %arg3[%c0, %c0_0] : memref<16x128xf32, #tpu.memory_space<vmem>>, vector<16x128xf32>
    %c0_1 = arith.constant 0 : index
    %c0_2 = arith.constant 0 : index
    %1 = vector.load %arg1[%c0_1, %c0_2] : memref<8x16xf32, #tpu.memory_space<vmem>>, vector<8x16xf32>
    %c0_3 = arith.constant 0 : index
    %c0_4 = arith.constant 0 : index
    %2 = vector.load %arg2[%c0_3, %c0_4] : memref<8x4xf32, #tpu.memory_space<vmem>>, vector<8x4xf32>
    %cst = arith.constant dense<0.000000e+00> : vector<8x128xf32>
    %3 = tpu.matmul %1, %0, %cst {dimension_numbers = #tpu.dot_dimension_numbers<[1], [0], [0], [1], [0, 0, 1, 1], [], []>} : vector<8x16xf32>, vector<16x128xf32>, vector<8x128xf32> -> vector<8x128xf32>
    %c0_5 = arith.constant 0 : index
    %c0_6 = arith.constant 0 : index
    %4 = vector.load %arg4[%c0_5, %c0_6] : memref<1x128xf32, #tpu.memory_space<vmem>>, vector<1x128xf32>
    %5 = vector.broadcast %4 : vector<1x128xf32> to vector<8x128xf32>
    %6 = arith.addf %3, %5 : vector<8x128xf32>
    %cst_7 = arith.constant 0.000000e+00 : f32
    %7 = vector.broadcast %cst_7 : f32 to vector<8x128xf32>
    %8 = arith.maximumf %6, %7 : vector<8x128xf32>
    %c0_8 = arith.constant 0 : index
    %c0_9 = arith.constant 0 : index
    %9 = vector.load %arg5[%c0_8, %c0_9] : memref<128x128xf32, #tpu.memory_space<vmem>>, vector<128x128xf32>
    %cst_10 = arith.constant dense<0.000000e+00> : vector<8x128xf32>
    %10 = tpu.matmul %8, %9, %cst_10 {dimension_numbers = #tpu.dot_dimension_numbers<[1], [0], [0], [1], [0, 0, 1, 1], [], []>} : vector<8x128xf32>, vector<128x128xf32>, vector<8x128xf32> -> vector<8x128xf32>
    %c0_11 = arith.constant 0 : index
    %c0_12 = arith.constant 0 : index
    %11 = vector.load %arg6[%c0_11, %c0_12] : memref<4x128xf32, #tpu.memory_space<vmem>>, vector<4x128xf32>
    %cst_13 = arith.constant dense<0.000000e+00> : vector<8x128xf32>
    %12 = tpu.matmul %2, %11, %cst_13 {dimension_numbers = #tpu.dot_dimension_numbers<[1], [0], [0], [1], [0, 0, 1, 1], [], []>} : vector<8x4xf32>, vector<4x128xf32>, vector<8x128xf32> -> vector<8x128xf32>
    %13 = arith.addf %10, %12 : vector<8x128xf32>
    %c0_14 = arith.constant 0 : index
    %c0_15 = arith.constant 0 : index
    %14 = vector.load %arg7[%c0_14, %c0_15] : memref<1x128xf32, #tpu.memory_space<vmem>>, vector<1x128xf32>
    %15 = vector.broadcast %14 : vector<1x128xf32> to vector<8x128xf32>
    %16 = arith.addf %13, %15 : vector<8x128xf32>
    %cst_16 = arith.constant 0.000000e+00 : f32
    %17 = vector.broadcast %cst_16 : f32 to vector<8x128xf32>
    %18 = arith.maximumf %16, %17 : vector<8x128xf32>
    %c0_17 = arith.constant 0 : index
    %c0_18 = arith.constant 0 : index
    %19 = vector.load %arg8[%c0_17, %c0_18] : memref<1x128xf32, #tpu.memory_space<vmem>>, vector<1x128xf32>
    %20 = vector.broadcast %19 : vector<1x128xf32> to vector<8x128xf32>
    %21 = arith.mulf %18, %20 : vector<8x128xf32>
    %cst_19 = arith.constant dense<0.000000e+00> : vector<8xf32>
    %22 = vector.multi_reduction <add>, %21, %cst_19 [1] : vector<8x128xf32> to vector<8xf32>
    %23 = vector.shape_cast %22 : vector<8xf32> to vector<8x1xf32>
    %c0_20 = arith.constant 0 : index
    %24 = memref.load %arg9[%c0_20] : memref<1xf32, #tpu.memory_space<smem>>
    %25 = vector.broadcast %24 : f32 to vector<8x1xf32>
    %26 = arith.addf %23, %25 : vector<8x1xf32>
    %c0_21 = arith.constant 0 : index
    %c0_22 = arith.constant 0 : index
    %27 = vector.load %arg10[%c0_21, %c0_22] : memref<8x1xf32, #tpu.memory_space<vmem>>, vector<8x1xf32>
    tpu.vector_store %arg10[%c0_21, %c0_22], %26 {strides = array<i32>} : memref<8x1xf32, #tpu.memory_space<vmem>>, vector<8x1xf32>,
    return
  }
  func.func @transform_0(%arg0: i32) -> (i32, i32) {
    %c0_i32 = arith.constant 0 : i32
    %c0_i32_0 = arith.constant 0 : i32
    return %arg0, %c0_i32 : i32, i32
  }
  func.func @transform_1(%arg0: i32) -> (i32, i32) {
    %c0_i32 = arith.constant 0 : i32
    %c0_i32_0 = arith.constant 0 : i32
    return %arg0, %c0_i32 : i32, i32
  }
  func.func @transform_2(%arg0: i32) -> (i32, i32) {
    %c0_i32 = arith.constant 0 : i32
    %c0_i32_0 = arith.constant 0 : i32
    %c0_i32_1 = arith.constant 0 : i32
    return %c0_i32, %c0_i32_0 : i32, i32
  }
  func.func @transform_3(%arg0: i32) -> (i32, i32) {
    %c0_i32 = arith.constant 0 : i32
    %c0_i32_0 = arith.constant 0 : i32
    %c0_i32_1 = arith.constant 0 : i32
    return %c0_i32, %c0_i32_0 : i32, i32
  }
  func.func @transform_4(%arg0: i32) -> (i32, i32) {
    %c0_i32 = arith.constant 0 : i32
    %c0_i32_0 = arith.constant 0 : i32
    %c0_i32_1 = arith.constant 0 : i32
    return %c0_i32, %c0_i32_0 : i32, i32
  }
  func.func @transform_5(%arg0: i32) -> (i32, i32) {
    %c0_i32 = arith.constant 0 : i32
    %c0_i32_0 = arith.constant 0 : i32
    %c0_i32_1 = arith.constant 0 : i32
    return %c0_i32, %c0_i32_0 : i32, i32
  }
  func.func @transform_6(%arg0: i32) -> (i32, i32) {
    %c0_i32 = arith.constant 0 : i32
    %c0_i32_0 = arith.constant 0 : i32
    %c0_i32_1 = arith.constant 0 : i32
    return %c0_i32, %c0_i32_0 : i32, i32
  }
  func.func @transform_7(%arg0: i32) -> (i32, i32) {
    %c0_i32 = arith.constant 0 : i32
    %c0_i32_0 = arith.constant 0 : i32
    %c0_i32_1 = arith.constant 0 : i32
    return %c0_i32, %c0_i32_0 : i32, i32
  }
  func.func @transform_8(%arg0: i32) -> i32 {
    %c0_i32 = arith.constant 0 : i32
    %c0_i32_0 = arith.constant 0 : i32
    return %c0_i32 : i32
  }
  func.func @transform_9(%arg0: i32) -> (i32, i32) {
    %c0_i32 = arith.constant 0 : i32
    %c0_i32_0 = arith.constant 0 : i32
    return %arg0, %c0_i32 : i32, i32
  }
}

</mosaic_0001>

<bundles_post_ra>
// kernel: tpu_custom_call.1
= control target key start
LH: loop header
LB: loop body
LE: loop exit
PB: predicated region body
PF: predicated region fallthrough
CT: control target
= control target key end

     0   :  { %15 = vsyncpa [#allocation4], 0  ;;  %s333_s0 = inlined_call_operand.vmem [shape: f32[8,16], index: 0, kind: input, shape index: {}]   ;;  %s334_s1 = inlined_call_operand.vmem [shape: f32[8,4], index: 1, kind: input, shape index: {}]   ;;  %s335_s2 = inlined_call_operand.hbm [shape: f32[16,128], index: 2, kind: input, shape index: {}]   ;;  %s336_s3 = inlined_call_operand.vmem [shape: f32[1,128], index: 3, kind: input, shape index: {}]   ;;  %s337_s4 = inlined_call_operand.hbm [shape: f32[128,128], index: 4, kind: input, shape index: {}]   ;;  %s338_s5 = inlined_call_operand.vmem [shape: f32[4,128], index: 5, kind: input, shape index: {}]   ;;  %s339_s6 = inlined_call_operand.vmem [shape: f32[1,128], index: 6, kind: input, shape index: {}]   ;;  %s340_s7 = inlined_call_operand.vmem [shape: f32[1,128], index: 7, kind: input, shape index: {}]   ;;  %s341_s8 = inlined_call_operand.<no memory space> [shape: f32[1], index: 8, kind: input, shape index: {}]   ;;  %s342_s9 = inlined_call_operand.vmem [shape: f32[8,1], index: 9, kind: output, shape index: {}]  }
   0x1   :  { %s25_s11 = sshll.u32 %s335_s2, 4  ;;  %s26_s11 = int_to_ptr.hbm [resolvable:$true] %s25_s11 }
   0x2   :  { %16 = vsyncpa [#allocation6], 0  ;;  %s249_s12 = smov [#allocation3]   ;;  %s40_s16 = sshll.u32 %s337_s4, 4  ;;  %s41_s16 = int_to_ptr.hbm [resolvable:$true] %s40_s16 }
   0x3   :  { %s27_s13 = sshll.u32 %s249_s12, 4  ;;  %s250_s17 = smov 128   ;;  %s28_s13 = int_to_ptr.vmem [resolvable:$true] %s27_s13 }
   0x4   :  { %s251_s18 = smov 8   ;;  %s252_s19 = smov [#allocation5]  }
   0x5   :  { %33 = dma.hbm_to_vmem [thread:$0]  %s26_s11, 256, %s28_s13, [#allocation4], %s250_s17, %s250_s17, %s251_s18  }
   0x6   :  { %s42_s20 = sshll.u32 %s252_s19, 4  ;;  %s43_s20 = int_to_ptr.vmem [resolvable:$true] %s42_s20 }
   0x7   :  { %48 = dma.hbm_to_vmem [thread:$0]  %s41_s16, 2048, %s43_s20, [#allocation6], %s250_s17, %s250_s17, %s251_s18  }
   0x8   :  { %245 = dma.done.wait [#allocation4], 256  }
   0x9   :  { %246 = vsyncadd [#allocation4], 4294967040 }
   0xa   :  { %247 = dma.done.wait [#allocation6], 2048  }
   0xb   :  { %248 = vsyncadd [#allocation6], 4294965248  ;;  %v66_v0 = vld [vmem:[#allocation3 + $0x8] sm:$0xff]  ;;  %v65_v1 = vld [vmem:[#allocation3] sm:$0xff]  ;;  %vm73_vm0 = vcmask 130048   ;;  %vm119_vm1 = vcmask 1043456   ;;  %v177_v33 = vstv %s341_s8 }
   0xc   :  { %91 = vmatpush.msra.mxu0 %v66_v0  ;;  %v67_v2 = vld [vmem:[%s333_s0] sm:$0xff]  ;;  %v113_v3 = vld [vmem:[#allocation5 + $0x78] sm:$0xff]  ;;  %v111_v5 = vld [vmem:[#allocation5 + $0x68] sm:$0xff]  ;;  %vm115_vm2 = vcmask 31744   ;;  %vm179_vm3 = vcmask 7168  }
   0xd   :  { %v112_v4 = vld [vmem:[#allocation5 + $0x70] sm:$0xff]  ;;  %143 = vmatpush.msra.mxu2 %v113_v3  ;;  %v110_v6 = vld [vmem:[#allocation5 + $0x60] sm:$0xff]  ;;  %v109_v7 = vld [vmem:[#allocation5 + $0x58] sm:$0xff] }
   0xe   :  { %92 = vmatpush.msra.mxu0 %v65_v1  ;;  %v108_v8 = vld [vmem:[#allocation5 + $0x50] sm:$0xff]  ;;  %v107_v9 = vld [vmem:[#allocation5 + $0x48] sm:$0xff]  ;;  %v106_v10 = vld [vmem:[#allocation5 + $0x40] sm:$0xff] }
   0xf   :  { %187 = vmatmul.msk.f32.vlgmr.msra.gmra.mxu0 %vm73_vm0, %v67_v2  ;;  %144 = vmatpush.msra.mxu2 %v112_v4  ;;  %v105_v11 = vld [vmem:[#allocation5 + $0x38] sm:$0xff]  ;;  %v104_v12 = vld [vmem:[#allocation5 + $0x30] sm:$0xff]  ;;  %v103_v13 = vld [vmem:[#allocation5 + $0x28] sm:$0xff] }
  0x10   :  { %v102_v14 = vld [vmem:[#allocation5 + $0x20] sm:$0xff]  ;;  %v101_v15 = vld [vmem:[#allocation5 + $0x18] sm:$0xff]  ;;  %v100_v16 = vld [vmem:[#allocation5 + $0x10] sm:$0xff] }
  0x11   :  { %145 = vmatpush.msra.mxu2 %v111_v5  ;;  %v99_v17 = vld [vmem:[#allocation5 + $0x8] sm:$0xff]  ;;  %v98_v18 = vld [vmem:[#allocation5] sm:$0xff]  ;;  %v114_v19 = vld [vmem:[%s338_s5] sm:$0xf] }
  0x12   :  { %v68_v20 = vld [vmem:[%s334_s1] sm:$0xff]  ;;  %188 = vmatpush.msk.msra.mxu1 %vm119_vm1, %v114_v19 }
  0x13   :  { %146 = vmatpush.msra.mxu2 %v110_v6  ;;  %189 = vmatmul.msk.f32.vlgmr.msra.gmra.mxu1 %vm115_vm2, %v68_v20  ;;  %v194_v21 = vld [vmem:[%s336_s3] ss:$0 sm:$0xff] }
  0x14   :  { %v195_v26 = vld [vmem:[%s339_s6] ss:$0 sm:$0xff] }
  0x15   :  { %147 = vmatpush.msra.mxu2 %v109_v7  ;;  %v196_v30 = vld [vmem:[%s340_s7] ss:$0 sm:$0xff] }
  0x17   :  { %148 = vmatpush.msra.mxu2 %v108_v8 }
  0x19   :  { %149 = vmatpush.msra.mxu2 %v107_v9 }
  0x1b   :  { %150 = vmatpush.msra.mxu2 %v106_v10 }
  0x1d   :  { %151 = vmatpush.msra.mxu2 %v105_v11 }
  0x1f   :  { %152 = vmatpush.msra.mxu2 %v104_v12 }
  0x21   :  { %153 = vmatpush.msra.mxu2 %v103_v13 }
  0x23   :  { %154 = vmatpush.msra.mxu2 %v102_v14 }
  0x25   :  { %155 = vmatpush.msra.mxu2 %v101_v15 }
  0x27   :  { %156 = vmatpush.msra.mxu2 %v100_v16 }
  0x29   :  { %157 = vmatpush.msra.mxu2 %v99_v17 }
  0x2b   :  { %158 = vmatpush.msra.mxu2 %v98_v18 }
  0x8c   :  { %v94_v22 = vpop.f32.mrf.mxu0 }
  0x8d   :  { %v95_v23 = vadd.f32 %v194_v21, %v94_v22 }
  0x8f   :  { %v97_v24 = vmax.f32 %v95_v23, 0.0 }
  0x90   :  { %v140_v25 = vpop.f32.mrf.mxu1 }
  0x91   :  { %159 = vmatmul.f32.vlgmr.msra.gmra.mxu2 %v97_v24 }
 0x114   :  { %v160_v27 = vpop.f32.mrf.mxu2 }
 0x115   :  { %v161_v28 = vadd.f32 %v160_v27, %v140_v25 }
 0x117   :  { %v167_v29 = vadd.f32 %v195_v26, %v161_v28 }
 0x119   :  { %v168_v31 = vmax.f32 %v167_v29, 0.0 }
 0x11b   :  { %v173_v32 = vmul.f32 %v196_v30, %v168_v31 }
 0x11d   :  { %174 = vadd.xlane.f32.xlu0 %v173_v32 }
 0x190   :  { %v175_v34 = vpop.xlane.xlu0 %174 }
 0x191   :  { %v178_v35 = vadd.f32 %v177_v33, %v175_v34 }
 0x193   :  { %180 = vst.msk [vmem:[%s342_s9] sm:$0xff] %vm179_vm3, %v178_v35 }
 0x194   :  { %185 = vsyncpa [#allocation4], 1 }
 0x195   :  { %186 = vsyncpa [#allocation6], 1 }

</bundles_post_ra>
